<compile_context>
chip_gen: v6e
topology: v6e:2x2x1
jax: 0.10.0
libtpu: 0.0.40
codegen_flags: <defaults>
</compile_context>

<pallas_src>
import functools

import jax
import jax.numpy as jnp
from jax.experimental import pallas as pl
from jax.experimental.pallas import tpu as pltpu

LANE = 128  # TPU lane width; all kernel-facing last dims are padded to this.


# ---------------------------------------------------------------------------
# Single fused Pallas kernel (per-batch grid step):
#     encoder -> reparameterize -> decoder
# ---------------------------------------------------------------------------
def vae_fused_kernel(lens_ref, x_ref, eps_ref, w_ref, b_ref, poswo_ref,
                     stats_ref, out_ref):
    """All intermediates (h / mu / logvar / z) stay in VMEM / vregs.

    lens_ref : [B]        int32 sequence lengths (SMEM, scalar-prefetched)
    x_ref    : [T, 128]   bf16 frame features for batch b (J*F real cols)
    eps_ref  : [1, 128]   f32 N(0,1) noise (E real cols, rest zero)
    w_ref    : [128, 640] bf16 packed weights: W_e | W_mu | W_lv | W_z | W_o
    b_ref    : [8, 128]   f32 packed biases (rows: b_e | b_mu | b_lv | b_z)
    poswo_ref: [T, 128]   f32 precomputed pos @ W_o + b_o table
    stats_ref: [1, 384]   f32 packed output: mu | logvar | z (128-lane slots)
    out_ref  : [T, 128]   f32 per-frame pose (Dout real cols), length-masked
    """
    b = pl.program_id(0)
    T = x_ref.shape[0]

    length = lens_ref[b]                                       # int32 scalar

    # frame-validity mask, generated natively in the [T, LANE] layout
    row_ids = jax.lax.broadcasted_iota(jnp.int32, (T, LANE), 0)
    mask = (row_ids < length).astype(jnp.float32)              # [T, 128] f32

    mm_dtype = w_ref.dtype
    w_e = w_ref[:, 0 * LANE:1 * LANE]
    w_mu = w_ref[:, 1 * LANE:2 * LANE]
    w_lv = w_ref[:, 2 * LANE:3 * LANE]
    w_z = w_ref[:, 3 * LANE:4 * LANE]
    w_o = w_ref[:, 4 * LANE:5 * LANE]

    b_e = b_ref[0:1, :]
    b_mu = b_ref[1:2, :]
    b_lv = b_ref[2:3, :]
    b_z = b_ref[3:4, :]

    # ---- encoder: frame embedding -> masked mean pool -> (mu, logvar) ------
    h = jnp.dot(x_ref[...], w_e, preferred_element_type=jnp.float32) + b_e
    h = jnp.maximum(h, 0.0)                                    # [T, 128] f32

    denom = jnp.maximum(length.astype(jnp.float32), 1.0)       # guard len==0
    pooled = jnp.sum(h * mask, axis=0, keepdims=True) * (1.0 / denom)  # [1,128]

    pooled_mm = pooled.astype(mm_dtype)
    mu = jnp.dot(pooled_mm, w_mu, preferred_element_type=jnp.float32) + b_mu
    logvar = jnp.dot(pooled_mm, w_lv, preferred_element_type=jnp.float32) + b_lv

    # ---- reparameterize: z = eps * exp(logvar / 2) + mu ---------------------
    z = eps_ref[...] * jnp.exp(logvar * 0.5) + mu              # [1, 128] f32

    # 128-lane-aligned packed stats (whole-vreg concat + unmasked store)
    stats_ref[...] = jnp.concatenate([mu, logvar, z], axis=-1)  # [1, 384]

    # ---- decoder: z -> hidden -> per-frame pose ------------------------------
    hd = jnp.dot(z.astype(mm_dtype), w_z,
                 preferred_element_type=jnp.float32) + b_z
    hd = jnp.maximum(hd, 0.0)                                  # [1, 128] f32

    hW = jnp.dot(hd.astype(mm_dtype), w_o,
                 preferred_element_type=jnp.float32)           # [1, 128] f32

    # pos @ W_o + b_o was precomputed; broadcast over sublanes is cheap.
    # TODO(synk): at production T, tile this over a T grid axis instead of one
    # full [T,128] block per batch.
    out_ref[...] = (hW + poswo_ref[...]) * mask


def fused_vae_call(lengths, x3d, eps3, params, *, B, T):
    grid_spec = pltpu.PrefetchScalarGridSpec(
        num_scalar_prefetch=1,                 # lengths -> SMEM
        grid=(B,),
        in_specs=[
            pl.BlockSpec((None, T, LANE), lambda b, lens: (b, 0, 0)),    # x
            pl.BlockSpec((None, 1, LANE), lambda b, lens: (b, 0, 0)),    # eps
            pl.BlockSpec((LANE, 5 * LANE), lambda b, lens: (0, 0)),      # W_all
            pl.BlockSpec((8, LANE), lambda b, lens: (0, 0)),             # b_all
            pl.BlockSpec((T, LANE), lambda b, lens: (0, 0)),             # pos_wo
        ],
        out_specs=(
            pl.BlockSpec((None, 1, 3 * LANE), lambda b, lens: (b, 0, 0)),  # stats
            pl.BlockSpec((None, T, LANE), lambda b, lens: (b, 0, 0)),      # out
        ),
    )
    return pl.pallas_call(
        vae_fused_kernel,
        out_shape=(jax.ShapeDtypeStruct((B, 1, 3 * LANE), jnp.float32),
                   jax.ShapeDtypeStruct((B, T, LANE), jnp.float32)),
        grid_spec=grid_spec,
        compiler_params=pltpu.CompilerParams(
            dimension_semantics=("parallel",),        # shard B across TCs
            vmem_limit_bytes=32 * 1024 * 1024),
    )(lengths, x3d, eps3,
      params["W_all"], params["b_all"], params["pos_wo"])


# ---------------------------------------------------------------------------
# Parameter init (weights pre-packed into lane-dense slabs)
# ---------------------------------------------------------------------------
def init_params(key, din, e, dout, num_frames, *, mm_dtype=jnp.bfloat16):
    ks = jax.random.split(key, 6)

    def lin(k, i, o):
        return jax.random.normal(k, (i, o), jnp.float32) / jnp.sqrt(jnp.float32(i))

    w_e = lin(ks[0], din, e)
    w_mu = lin(ks[1], e, e)
    w_lv = lin(ks[2], e, e)
    w_z = lin(ks[3], e, e)
    pos = 0.02 * jax.random.normal(ks[4], (num_frames, e), jnp.float32)
    w_o = lin(ks[5], e, dout)
    b_o = jnp.zeros((dout,), jnp.float32)

    def pad128(w):
        return jnp.zeros((LANE, LANE), jnp.float32).at[:w.shape[0], :w.shape[1]].set(w)

    # one [128, 640] slab: W_e | W_mu | W_lv | W_z | W_o  (128-lane slots)
    w_all = jnp.concatenate(
        [pad128(w_e), pad128(w_mu), pad128(w_lv), pad128(w_z), pad128(w_o)],
        axis=1).astype(mm_dtype)

    # rows: b_e | b_mu | b_lv | b_z  (zero-initialized; b_o folded into pos_wo)
    b_all = jnp.zeros((8, LANE), jnp.float32)

    # input-invariant decoder table: pos @ W_o + b_o, lane-padded
    pos_wo_small = pos @ w_o + b_o[None, :]
    pos_wo = jnp.zeros((num_frames, LANE), jnp.float32).at[:, :dout].set(pos_wo_small)

    return {"W_all": w_all, "b_all": b_all, "pos_wo": pos_wo}


def lengths_to_mask(lengths, max_len):
    # matches Model.lengths_to_mask: index < lengths.unsqueeze(1)
    return jnp.arange(max_len)[None, :] < lengths[:, None]


# ---------------------------------------------------------------------------
# Model forward (glue: layout plumbing only; all math is in the fused kernel)
# ---------------------------------------------------------------------------
def model_forward(params, x, lengths, eps_key, latent_dim):
    """Mirrors Model.forward(batch): encoder -> reparameterize -> decoder."""
    B, J, F, T = x.shape
    din = J * F
    E = latent_dim

    mask_bool = lengths_to_mask(lengths, T)                  # [B, T] bool

    # batch['x_xyz'] = batch['x']
    x_xyz = x

    # [B, J, F, T] -> [B, T, J*F] -> lane-pad to 128, cast matmul operand to bf16
    x_btd = jnp.transpose(x, (0, 3, 1, 2)).reshape(B, T, din)
    x3d = jnp.pad(x_btd, ((0, 0), (0, 0), (0, LANE - din))).astype(
        params["W_all"].dtype)

    # eps ~ N(0,1), lane-padded with zeros beyond E (so padded z lanes stay 0)
    eps = jax.random.normal(eps_key, (B, E), jnp.float32)
    eps3 = jnp.pad(eps, ((0, 0), (0, LANE - E)))[:, None, :]   # [B, 1, 128]

    stats, out3 = fused_vae_call(lengths.astype(jnp.int32), x3d, eps3, params,
                                 B=B, T=T)

    # 128-lane-aligned packing: mu | logvar | z
    mu = stats[:, 0, 0 * LANE:0 * LANE + E]
    logvar = stats[:, 0, 1 * LANE:1 * LANE + E]
    z = stats[:, 0, 2 * LANE:2 * LANE + E]

    # [B, T, 128] -> [B, J, F, T]
    out_btd = out3[:, :, :din]
    output = jnp.transpose(out_btd.reshape(B, T, J, F), (0, 2, 3, 1))

    return {
        "x": x, "x_xyz": x_xyz, "mask": mask_bool, "lengths": lengths,
        "mu": mu, "logvar": logvar, "z": z,
        "output": output,
        "output_xyz": output,    # batch['output_xyz'] = batch['output']
    }


# ---------------------------------------------------------------------------
if __name__ == "__main__":
    # Small, module-consistent shapes:
    #   batch=2, njoints=4, nfeats=6, num_frames=8, latent_dim(spatial_embed)=8
    #   -> total latent dim = njoints * latent_dim = 32
    B, J, F, T = 2, 4, 6, 8
    LATENT = 8
    E = J * LATENT            # 32, == self.latent_dim in the PyTorch module
    DIN = DOUT = J * F        # 24

    root = jax.random.PRNGKey(0)
    k_param, k_x, k_eps = jax.random.split(root, 3)

    params = init_params(k_param, DIN, E, DOUT, T)
    x = jax.random.normal(k_x, (B, J, F, T), jnp.float32)
    lengths = jnp.array([T, 5], dtype=jnp.int32)

    fwd = jax.jit(functools.partial(model_forward, latent_dim=E))
    batch = fwd(params, x, lengths, k_eps)
    jax.block_until_ready(batch["output_xyz"])

    assert batch["mu"].shape == (B, E)
    assert batch["logvar"].shape == (B, E)
    assert batch["z"].shape == (B, E)
    assert batch["output"].shape == (B, J, F, T)
    assert batch["output_xyz"].shape == (B, J, F, T)
    # frames past each sequence length must be exactly zero
    assert float(jnp.abs(batch["output"][1, :, :, 5:]).max()) == 0.0

    print("KERNEL_OK")
</pallas_src>

<mosaic_0001>
module attributes {stable_mosaic.version = 11 : i64} {
  func.func @vae_fused_kernel(%arg0: i32, %arg1: memref<2xi32, #tpu.memory_space<smem>>, %arg2: memref<1x8x128xbf16, #tpu.memory_space<vmem>>, %arg3: memref<1x1x128xf32, #tpu.memory_space<vmem>>, %arg4: memref<128x640xbf16, #tpu.memory_space<vmem>>, %arg5: memref<8x128xf32, #tpu.memory_space<vmem>>, %arg6: memref<8x128xf32, #tpu.memory_space<vmem>>, %arg7: memref<1x1x384xf32, #tpu.memory_space<vmem>>, %arg8: memref<1x8x128xf32, #tpu.memory_space<vmem>>) attributes {dimension_semantics = [#tpu.dimension_semantics<parallel>], iteration_bounds = array<i64: 2>, scalar_prefetch = 1 : i64, scratch_operands = 0 : i64, tpu.core_type = #tpu.core_type<tc>, window_params = [{transform_indices = @transform_0, window_bounds = array<i64: 1, 8, 128>}, {transform_indices = @transform_1, window_bounds = array<i64: 1, 1, 128>}, {pipeline_mode = #tpu.pipeline_mode<synchronous>, transform_indices = @transform_2, window_bounds = array<i64: 128, 640>}, {pipeline_mode = #tpu.pipeline_mode<synchronous>, transform_indices = @transform_3, window_bounds = array<i64: 8, 128>}, {pipeline_mode = #tpu.pipeline_mode<synchronous>, transform_indices = @transform_4, window_bounds = array<i64: 8, 128>}, {transform_indices = @transform_5, window_bounds = array<i64: 1, 1, 384>}, {transform_indices = @transform_6, window_bounds = array<i64: 1, 8, 128>}]} {
    %0 = arith.index_cast %arg0 : i32 to index
    %1 = memref.load %arg1[%0] : memref<2xi32, #tpu.memory_space<smem>>
    %2 = tpu.iota {dimensions = array<i32: 0>} : vector<8x128xi32>
    %3 = vector.broadcast %1 : i32 to vector<8x128xi32>
    %4 = arith.cmpi slt, %2, %3 : vector<8x128xi32>
    %5 = arith.extui %4 : vector<8x128xi1> to vector<8x128xi32>
    %6 = arith.sitofp %5 : vector<8x128xi32> to vector<8x128xf32>
    %c0 = arith.constant 0 : index
    %c0_0 = arith.constant 0 : index
    %7 = vector.load %arg4[%c0, %c0_0] : memref<128x640xbf16, #tpu.memory_space<vmem>>, vector<128x128xbf16>
    %c0_1 = arith.constant 0 : index
    %c128 = arith.constant 128 : index
    %8 = vector.load %arg4[%c0_1, %c128] : memref<128x640xbf16, #tpu.memory_space<vmem>>, vector<128x128xbf16>
    %c0_2 = arith.constant 0 : index
    %c256 = arith.constant 256 : index
    %9 = vector.load %arg4[%c0_2, %c256] : memref<128x640xbf16, #tpu.memory_space<vmem>>, vector<128x128xbf16>
    %c0_3 = arith.constant 0 : index
    %c384 = arith.constant 384 : index
    %10 = vector.load %arg4[%c0_3, %c384] : memref<128x640xbf16, #tpu.memory_space<vmem>>, vector<128x128xbf16>
    %c0_4 = arith.constant 0 : index
    %c512 = arith.constant 512 : index
    %11 = vector.load %arg4[%c0_4, %c512] : memref<128x640xbf16, #tpu.memory_space<vmem>>, vector<128x128xbf16>
    %c0_5 = arith.constant 0 : index
    %c0_6 = arith.constant 0 : index
    %12 = vector.load %arg5[%c0_5, %c0_6] : memref<8x128xf32, #tpu.memory_space<vmem>>, vector<1x128xf32>
    %c1 = arith.constant 1 : index
    %c0_7 = arith.constant 0 : index
    %13 = vector.load %arg5[%c1, %c0_7] : memref<8x128xf32, #tpu.memory_space<vmem>>, vector<1x128xf32>
    %c2 = arith.constant 2 : index
    %c0_8 = arith.constant 0 : index
    %14 = vector.load %arg5[%c2, %c0_8] : memref<8x128xf32, #tpu.memory_space<vmem>>, vector<1x128xf32>
    %c3 = arith.constant 3 : index
    %c0_9 = arith.constant 0 : index
    %15 = vector.load %arg5[%c3, %c0_9] : memref<8x128xf32, #tpu.memory_space<vmem>>, vector<1x128xf32>
    %c0_10 = arith.constant 0 : index
    %c0_11 = arith.constant 0 : index
    %c0_12 = arith.constant 0 : index
    %16 = vector.load %arg2[%c0_10, %c0_11, %c0_12] : memref<1x8x128xbf16, #tpu.memory_space<vmem>>, vector<1x8x128xbf16>
    %17 = vector.shape_cast %16 : vector<1x8x128xbf16> to vector<8x128xbf16>
    %cst = arith.constant dense<0.000000e+00> : vector<8x128xf32>
    %18 = tpu.matmul %17, %7, %cst {dimension_numbers = #tpu.dot_dimension_numbers<[1], [0], [0], [1], [0, 0, 1, 1], [], []>} : vector<8x128xbf16>, vector<128x128xbf16>, vector<8x128xf32> -> vector<8x128xf32>
    %19 = vector.broadcast %12 : vector<1x128xf32> to vector<8x128xf32>
    %20 = arith.addf %18, %19 : vector<8x128xf32>
    %cst_13 = arith.constant 0.000000e+00 : f32
    %21 = vector.broadcast %cst_13 : f32 to vector<8x128xf32>
    %22 = arith.maximumf %20, %21 : vector<8x128xf32>
    %23 = arith.sitofp %1 : i32 to f32
    %cst_14 = arith.constant 1.000000e+00 : f32
    %24 = arith.maximumf %23, %cst_14 : f32
    %25 = arith.mulf %22, %6 : vector<8x128xf32>
    %cst_15 = arith.constant dense<0.000000e+00> : vector<128xf32>
    %26 = vector.multi_reduction <add>, %25, %cst_15 [0] : vector<8x128xf32> to vector<128xf32>
    %27 = vector.shape_cast %26 : vector<128xf32> to vector<1x128xf32>
    %cst_16 = arith.constant 1.000000e+00 : f32
    %28 = arith.divf %cst_16, %24 : f32
    %29 = vector.broadcast %28 : f32 to vector<1x128xf32>
    %30 = arith.mulf %27, %29 : vector<1x128xf32>
    %31 = arith.truncf %30 : vector<1x128xf32> to vector<1x128xbf16>
    %cst_17 = arith.constant dense<0.000000e+00> : vector<1x128xf32>
    %32 = tpu.matmul %31, %8, %cst_17 {dimension_numbers = #tpu.dot_dimension_numbers<[1], [0], [0], [1], [0, 0, 1, 1], [], []>} : vector<1x128xbf16>, vector<128x128xbf16>, vector<1x128xf32> -> vector<1x128xf32>
    %33 = arith.addf %32, %13 : vector<1x128xf32>
    %cst_18 = arith.constant dense<0.000000e+00> : vector<1x128xf32>
    %34 = tpu.matmul %31, %9, %cst_18 {dimension_numbers = #tpu.dot_dimension_numbers<[1], [0], [0], [1], [0, 0, 1, 1], [], []>} : vector<1x128xbf16>, vector<128x128xbf16>, vector<1x128xf32> -> vector<1x128xf32>
    %35 = arith.addf %34, %14 : vector<1x128xf32>
    %c0_19 = arith.constant 0 : index
    %c0_20 = arith.constant 0 : index
    %c0_21 = arith.constant 0 : index
    %36 = vector.load %arg3[%c0_19, %c0_20, %c0_21] : memref<1x1x128xf32, #tpu.memory_space<vmem>>, vector<1x1x128xf32>
    %37 = vector.shape_cast %36 : vector<1x1x128xf32> to vector<1x128xf32>
    %cst_22 = arith.constant 5.000000e-01 : f32
    %38 = vector.broadcast %cst_22 : f32 to vector<1x128xf32>
    %39 = arith.mulf %35, %38 : vector<1x128xf32>
    %40 = math.exp %39 : vector<1x128xf32>
    %41 = arith.mulf %37, %40 : vector<1x128xf32>
    %42 = arith.addf %41, %33 : vector<1x128xf32>
    %43 = tpu.concatenate %33, %35, %42 in 1 : vector<1x128xf32>, vector<1x128xf32>, vector<1x128xf32> -> vector<1x384xf32>
    %c0_23 = arith.constant 0 : index
    %c0_24 = arith.constant 0 : index
    %c0_25 = arith.constant 0 : index
    %44 = vector.load %arg7[%c0_23, %c0_24, %c0_25] : memref<1x1x384xf32, #tpu.memory_space<vmem>>, vector<1x1x384xf32>
    %45 = vector.shape_cast %44 : vector<1x1x384xf32> to vector<1x384xf32>
    %46 = vector.shape_cast %43 : vector<1x384xf32> to vector<1x1x384xf32>
    tpu.vector_store %arg7[%c0_23, %c0_24, %c0_25], %46 {strides = array<i32>} : memref<1x1x384xf32, #tpu.memory_space<vmem>>, vector<1x1x384xf32>,
    %47 = arith.truncf %42 : vector<1x128xf32> to vector<1x128xbf16>
    %cst_26 = arith.constant dense<0.000000e+00> : vector<1x128xf32>
    %48 = tpu.matmul %47, %10, %cst_26 {dimension_numbers = #tpu.dot_dimension_numbers<[1], [0], [0], [1], [0, 0, 1, 1], [], []>} : vector<1x128xbf16>, vector<128x128xbf16>, vector<1x128xf32> -> vector<1x128xf32>
    %49 = arith.addf %48, %15 : vector<1x128xf32>
    %cst_27 = arith.constant 0.000000e+00 : f32
    %50 = vector.broadcast %cst_27 : f32 to vector<1x128xf32>
    %51 = arith.maximumf %49, %50 : vector<1x128xf32>
    %52 = arith.truncf %51 : vector<1x128xf32> to vector<1x128xbf16>
    %cst_28 = arith.constant dense<0.000000e+00> : vector<1x128xf32>
    %53 = tpu.matmul %52, %11, %cst_28 {dimension_numbers = #tpu.dot_dimension_numbers<[1], [0], [0], [1], [0, 0, 1, 1], [], []>} : vector<1x128xbf16>, vector<128x128xbf16>, vector<1x128xf32> -> vector<1x128xf32>
    %c0_29 = arith.constant 0 : index
    %c0_30 = arith.constant 0 : index
    %54 = vector.load %arg6[%c0_29, %c0_30] : memref<8x128xf32, #tpu.memory_space<vmem>>, vector<8x128xf32>
    %55 = vector.broadcast %53 : vector<1x128xf32> to vector<8x128xf32>
    %56 = arith.addf %55, %54 : vector<8x128xf32>
    %57 = arith.mulf %56, %6 : vector<8x128xf32>
    %c0_31 = arith.constant 0 : index
    %c0_32 = arith.constant 0 : index
    %c0_33 = arith.constant 0 : index
    %58 = vector.load %arg8[%c0_31, %c0_32, %c0_33] : memref<1x8x128xf32, #tpu.memory_space<vmem>>, vector<1x8x128xf32>
    %59 = vector.shape_cast %58 : vector<1x8x128xf32> to vector<8x128xf32>
    %60 = vector.shape_cast %57 : vector<8x128xf32> to vector<1x8x128xf32>
    tpu.vector_store %arg8[%c0_31, %c0_32, %c0_33], %60 {strides = array<i32>} : memref<1x8x128xf32, #tpu.memory_space<vmem>>, vector<1x8x128xf32>,
    return
  }
  func.func @transform_0(%arg0: i32, %arg1: memref<2xi32, #tpu.memory_space<smem>>) -> (i32, i32, i32) {
    %c0_i32 = arith.constant 0 : i32
    %c0_i32_0 = arith.constant 0 : i32
    %c0_i32_1 = arith.constant 0 : i32
    return %arg0, %c0_i32, %c0_i32_0 : i32, i32, i32
  }
  func.func @transform_1(%arg0: i32, %arg1: memref<2xi32, #tpu.memory_space<smem>>) -> (i32, i32, i32) {
    %c0_i32 = arith.constant 0 : i32
    %c0_i32_0 = arith.constant 0 : i32
    %c0_i32_1 = arith.constant 0 : i32
    return %arg0, %c0_i32, %c0_i32_0 : i32, i32, i32
  }
  func.func @transform_2(%arg0: i32, %arg1: memref<2xi32, #tpu.memory_space<smem>>) -> (i32, i32) {
    %c0_i32 = arith.constant 0 : i32
    %c0_i32_0 = arith.constant 0 : i32
    %c0_i32_1 = arith.constant 0 : i32
    return %c0_i32, %c0_i32_0 : i32, i32
  }
  func.func @transform_3(%arg0: i32, %arg1: memref<2xi32, #tpu.memory_space<smem>>) -> (i32, i32) {
    %c0_i32 = arith.constant 0 : i32
    %c0_i32_0 = arith.constant 0 : i32
    %c0_i32_1 = arith.constant 0 : i32
    return %c0_i32, %c0_i32_0 : i32, i32
  }
  func.func @transform_4(%arg0: i32, %arg1: memref<2xi32, #tpu.memory_space<smem>>) -> (i32, i32) {
    %c0_i32 = arith.constant 0 : i32
    %c0_i32_0 = arith.constant 0 : i32
    %c0_i32_1 = arith.constant 0 : i32
    return %c0_i32, %c0_i32_0 : i32, i32
  }
  func.func @transform_5(%arg0: i32, %arg1: memref<2xi32, #tpu.memory_space<smem>>) -> (i32, i32, i32) {
    %c0_i32 = arith.constant 0 : i32
    %c0_i32_0 = arith.constant 0 : i32
    %c0_i32_1 = arith.constant 0 : i32
    return %arg0, %c0_i32, %c0_i32_0 : i32, i32, i32
  }
  func.func @transform_6(%arg0: i32, %arg1: memref<2xi32, #tpu.memory_space<smem>>) -> (i32, i32, i32) {
    %c0_i32 = arith.constant 0 : i32
    %c0_i32_0 = arith.constant 0 : i32
    %c0_i32_1 = arith.constant 0 : i32
    return %arg0, %c0_i32, %c0_i32_0 : i32, i32, i32
  }
}

</mosaic_0001>

<bundles_post_ra>
// kernel: model_forward.1
= control target key start
LH: loop header
LB: loop body
LE: loop exit
PB: predicated region body
PF: predicated region fallthrough
CT: control target
= control target key end

     0   :  { %s1508_s0 = inlined_call_operand.vmem [shape: s32[2], index: 0, kind: input, shape index: {}]   ;;  %s1509_s1 = inlined_call_operand.vmem [shape: bf16[2,8,128], index: 1, kind: input, shape index: {}]   ;;  %s1510_s2 = inlined_call_operand.vmem [shape: f32[2,1,128], index: 2, kind: input, shape index: {}]   ;;  %s1511_s3 = inlined_call_operand.hbm [shape: bf16[128,640], index: 3, kind: input, shape index: {}]   ;;  %s1512_s4 = inlined_call_operand.vmem [shape: f32[8,128], index: 4, kind: input, shape index: {}]   ;;  %s1513_s5 = inlined_call_operand.vmem [shape: f32[8,128], index: 5, kind: input, shape index: {}]   ;;  %s1514_s6 = inlined_call_operand.vmem [shape: f32[2,1,384], index: 6, kind: output, shape index: {0}]   ;;  %s1515_s7 = inlined_call_operand.vmem [shape: f32[2,8,128], index: 7, kind: output, shape index: {1}]  }
   0x1   :  { %s13_s26 = sshll.u32 %s1508_s0, 4  ;;  %s14_s26 = int_to_ptr.vmem [resolvable:$true] %s13_s26 }
   0x2   :  { %s1272_s27 = scalar_lea.vmem %s14_s26, 16  ;;  %p1277_p1 = scmp.lt.s32.totalorder %s14_s26, %s14_s26 }
   0x3   :  { %p1273_p0 = scmp.ne.s32.totalorder %s14_s26, %s1272_s27  ;;  %p1278_p2 = scmp.lt.s32.totalorder %s1272_s27, %s1272_s27 }
   0x5   :  { %p1279_p3 = por %p1278_p2, %p1277_p1 }
   0x7   :  { %p1280_p4 = pnand %p1279_p3, %p1273_p0 }
   0x9   :  { %1283 = shalt.err (!%p1280_p4)  }
   0xa   :  { %s1324_s28 = smov [#allocation3]  }
   0xb   :  { %16 = dma.vmem_to_smem %s14_s26, 16, %s1324_s28, [#allocation2] }
   0xc   :  { %1314 = dma.done.wait [#allocation2], 16 }
   0xd   :  { %1315 = vsyncadd [#allocation2], 4294967280 }
   0xe   :  { %18 = sfence }
   0xf   :  { %19 = vsyncpa [#allocation5], 0  ;;  %s1375_s29 = smov 0  }
  0x10 LB: > { %s1381_s0 = sadd.s32 4294967295, %s1322_s29   ;;  %p1003_p5 = scmp.ge.s32.totalorder %s1322_s29, 1  ;;  %s1322_s29 = sphi %s1375_s29, %s25_s29  }
  0x11   : > { %p197_p6 = scmp.lt.s32.totalorder %s1322_s29, 3  ;;  %s1325_s30 = smov [#allocation4]  }
  0x12   : > { %s209_s8 = sshll.u32 %s1325_s30, 4  ;;  %p1210_p8 = scmp.eq.s32.totalorder %s1381_s0, 0  ;;  %s210_s8 = int_to_ptr.vmem [resolvable:$true] %s209_s8 }
  0x13   : > { %p1385_p7 = pnand %p1003_p5, %p197_p6  ;;  %s1295_s10 = scalar_lea.vmem %s210_s8, 5120 }
  0x14   : > { %p1296_p12 = scmp.ne.s32.totalorder %s210_s8, %s1295_s10  ;;  %p1303_p1 = scmp.lt.s32.totalorder %s210_s8, %s210_s8 }
  0x15   : > { %p1206_p9 = pneg %p1385_p7  ;;  %p1304_p2 = scmp.lt.s32.totalorder %s1295_s10, %s1295_s10 }
  0x17   : > { %p1207_p10 = pnand %p1210_p8, %p1206_p9  ;;  %p1305_p3 = por %p1304_p2, %p1303_p1 }
  0x19   : > { %p1286_p11 = pneg %p1207_p10 }
  0x1b   : > { %p1298_p13 = pnand %p1296_p12, %p1286_p11 }
  0x1d   : > { %p1299_p0 = pneg %p1298_p13 }
  0x1f   : > { %p1306_p4 = pnand %p1305_p3, %p1299_p0 }
  0x21   : > { %1309 = shalt.err (!%p1306_p4)
}
  0x22   : > { %s1326_s11 = smov 320   ;;  %s1327_s12 = smov 20  }
  0x23   : > { %1209 = dma.hbm_to_vmem [thread:$0]  (!%p1207_p10), %s1511_s3, 5120, %s210_s8, [#allocation5], %s1326_s11, %s1326_s11, %s1327_s12  }
  0x24   : > { %244 = sbr.rel (%p1385_p7) target bundleno = 909 (0x38d), region = 40 }
  0x29   : > { %1317 = dma.done.wait (%p1210_p8), [#allocation5], 5120  }
  0x2a   : > { %1319 = vsyncadd (%p1210_p8), [#allocation5], 4294962176  ;;  %v1328_v0 = vmov 0.0   ;;  %vm1329_vm0 = vmmov 0   ;;  %s1407_s15 = sld [smem:[#allocation3 + %s1381_s0]]  ;;  %s1330_s17 = smov 1.0   ;;  %v296_v28 = vlaneseq }
  0x2b   : > { %1099 = vmatprep.subr.bf16.mxu0 %v1328_v0  ;;  %1115 = vmatprep.mubr.msk.bf16.mxu0 %vm1329_vm0, %v1328_v0  ;;  %v1228_v1 = vld [vmem:[#allocation4 + $0x118] ss:$20 sps:$4 sm:$0xff]   ;;  %v1229_v2 = vld [vmem:[#allocation4 + $0xf0] ss:$20 sps:$4 sm:$0xff]   ;;  %p279_p5 = scmp.lt.s32.totalorder %s1381_s0, 1 }
  0x2c   : > { %1119 = vmatprep.subr.bf16.mxu1 %v1328_v0  ;;  %1135 = vmatprep.mubr.msk.bf16.mxu1 %vm1329_vm0, %v1328_v0  ;;  %v1230_v4 = vld [vmem:[#allocation4 + $0xc8] ss:$20 sps:$4 sm:$0xff]   ;;  %v1231_v6 = vld [vmem:[#allocation4 + $0xa0] ss:$20 sps:$4 sm:$0xff]   ;;  %v1232_v8 = vld [vmem:[#allocation4 + $0x78] ss:$20 sps:$4 sm:$0xff]  }
  0x2d   : > { %1100 = vmatpush3.bf16.msra.mxu0 %v1228_v1  ;;  %s1518_s0 = smov (!%p279_p5, %s1381_s0), 1  ;;  %v1236_v5 = vld [vmem:[#allocation4 + $0x11c] ss:$20 sps:$4 sm:$0xff]   ;;  %v1238_v7 = vld [vmem:[#allocation4 + $0xf4] ss:$20 sps:$4 sm:$0xff]   ;;  %v1448_v29 = vshrl.u32 %v296_v28, 7 }
  0x2e   : > { %1101 = vmatprep.subr.bf16.mxu0 %v1328_v0  ;;  %1120 = vmatpush3.bf16.msra.mxu1 %v1236_v5  ;;  %s1008_s19 = sshll.u32 %s1518_s0, 2  ;;  %v1233_v9 = vld [vmem:[#allocation4 + $0x50] ss:$20 sps:$4 sm:$0xff]   ;;  %v1234_v11 = vld [vmem:[#allocation4 + $0x28] ss:$20 sps:$4 sm:$0xff]   ;;  %s285_s10 = scalar_lea.vmem %s1510_s2, %s1518_s0  ;;  %vm706_vm2 = vcmp.lt.s32.totalorder %v296_v28, 384 }
  0x2f   : > { %1121 = vmatprep.subr.bf16.mxu1 %v1328_v0  ;;  %v1235_v12 = vld [vmem:[#allocation4] ss:$20 sps:$4 sm:$0xff]   ;;  %s282_s22 = scalar_lea.vmem %s1509_s1, %s1008_s19  ;;  %v1239_v15 = vld [vmem:[#allocation4 + $0xf8] ss:$20 sps:$4 sm:$0xff]   ;;  %v1241_v17 = vld [vmem:[#allocation4 + $0xd0] ss:$20 sps:$4 sm:$0xff]  }
  0x30   : > { %s480_s16 = scvt.s32.f32 %s1407_s15  ;;  %v386_v13 = vld [vmem:[%s282_s22] sm:$0xf]  ;;  %v1242_v18 = vld [vmem:[#allocation4 + $0xa4] ss:$20 sps:$4 sm:$0xff]   ;;  %v1243_v19 = vld [vmem:[#allocation4 + $0xa8] ss:$20 sps:$4 sm:$0xff]   ;;  %v298_v30 = vstv %s1407_s15 }
  0x31   : > { %1102 = vmatpush3.bf16.msra.mxu0 %v1229_v2  ;;  %v1237_v14 = vld [vmem:[#allocation4 + $0x120] ss:$20 sps:$4 sm:$0xff]   ;;  %v1244_v20 = vld [vmem:[#allocation4 + $0x7c] ss:$20 sps:$4 sm:$0xff]   ;;  %v1247_v23 = vld [vmem:[#allocation4 + $0x58] ss:$20 sps:$4 sm:$0xff]   ;;  %vm299_vm1 = vcmp.lt.s32.totalorder %v1448_v29, %v298_v30 }
  0x32   : > { %s481_s18 = smax.f32 %s1330_s17, %s480_s16  ;;  %1103 = vmatprep.subr.bf16.mxu0 %v1328_v0  ;;  %1122 = vmatpush3.bf16.msra.mxu1 %v1238_v7  ;;  %v1240_v16 = vld [vmem:[#allocation4 + $0xcc] ss:$20 sps:$4 sm:$0xff]   ;;  %v1246_v22 = vld [vmem:[#allocation4 + $0x54] ss:$20 sps:$4 sm:$0xff]   ;;  %v1249_v25 = vld [vmem:[#allocation4 + $0x30] ss:$20 sps:$4 sm:$0xff]  }
  0x33   : > { %v489_v3 = vstv %s481_s18  ;;  %1123 = vmatprep.subr.bf16.mxu1 %v1328_v0  ;;  %v1245_v21 = vld [vmem:[#allocation4 + $0x80] ss:$20 sps:$4 sm:$0xff]   ;;  %v1250_v26 = vld [vmem:[#allocation4 + $0x4] ss:$20 sps:$4 sm:$0xff]   ;;  %v1251_v27 = vld [vmem:[#allocation4 + $0x8] ss:$20 sps:$4 sm:$0xff]  }
  0x34   : > { %1268 = vrcp.f32 %v489_v3  ;;  %v1248_v24 = vld [vmem:[#allocation4 + $0x2c] ss:$20 sps:$4 sm:$0xff]   ;;  %v1456_v34 = vsel %vm299_vm1, 1.0, %v1328_v0  ;;  %v1252_v48 = vld [vmem:[#allocation4 + $0x124] ss:$20 sps:$4 sm:$0xff]   ;;  %s1199_s11 = smul.u32 3, %s1518_s0 }
  0x35   : > { %1104 = vmatpush3.bf16.msra.mxu0 %v1230_v4  ;;  %v1011_v31 = vld [vmem:[%s1512_s4] ss:$0 sm:$0xff]  ;;  %v1253_v50 = vld [vmem:[#allocation4 + $0xfc] ss:$20 sps:$4 sm:$0xff]   ;;  %v1254_v51 = vld [vmem:[#allocation4 + $0xd4] ss:$20 sps:$4 sm:$0xff]  }
  0x36   : > { %1105 = vmatprep.subr.bf16.mxu0 %v1328_v0  ;;  %1124 = vmatpush3.bf16.msra.mxu1 %v1240_v16  ;;  %v1255_v52 = vld [vmem:[#allocation4 + $0xac] ss:$20 sps:$4 sm:$0xff]   ;;  %v1256_v53 = vld [vmem:[#allocation4 + $0x84] ss:$20 sps:$4 sm:$0xff]   ;;  %v1257_v54 = vld [vmem:[#allocation4 + $0x5c] ss:$20 sps:$4 sm:$0xff]   ;;  %s289_s14 = scalar_lea.vmem %s1514_s6, %s1199_s11 }
  0x37   : > { %1125 = vmatprep.subr.bf16.mxu1 %v1328_v0  ;;  %v1258_v55 = vld [vmem:[#allocation4 + $0x34] ss:$20 sps:$4 sm:$0xff]   ;;  %v1259_v56 = vld [vmem:[#allocation4 + $0xc] ss:$20 sps:$4 sm:$0xff]   ;;  %v1263_v60 = vld [vmem:[#allocation4 + $0xb0] ss:$20 sps:$4 sm:$0xff]  }
  0x38   : > { %v1260_v57 = vld [vmem:[#allocation4 + $0x128] ss:$20 sps:$4 sm:$0xff]   ;;  %v1261_v58 = vld [vmem:[#allocation4 + $0x100] ss:$20 sps:$4 sm:$0xff]   ;;  %v1262_v59 = vld [vmem:[#allocation4 + $0xd8] ss:$20 sps:$4 sm:$0xff]  }
  0x39   : > { %1106 = vmatpush3.bf16.msra.mxu0 %v1231_v6  ;;  %v1264_v61 = vld [vmem:[#allocation4 + $0x88] ss:$20 sps:$4 sm:$0xff]   ;;  %v1265_v62 = vld [vmem:[#allocation4 + $0x60] ss:$20 sps:$4 sm:$0xff]   ;;  %v1266_v30 = vld [vmem:[#allocation4 + $0x38] ss:$20 sps:$4 sm:$0xff]  }
  0x3a   : > { %1107 = vmatprep.subr.bf16.mxu0 %v1328_v0  ;;  %1126 = vmatpush3.bf16.msra.mxu1 %v1242_v18  ;;  %v384_v63 = vld [vmem:[%s1512_s4 + $0x2] sm:$0x1]  ;;  %s1009_s19 = sshll.u32 %s1518_s0, 3 }
  0x3b   : > { %1127 = vmatprep.subr.bf16.mxu1 %v1328_v0  ;;  %s293_s22 = scalar_lea.vmem %s1515_s7, %s1009_s19 }
  0x3d   : > { %1108 = vmatpush3.bf16.msra.mxu0 %v1232_v8 }
  0x3e   : > { %1109 = vmatprep.subr.bf16.mxu0 %v1328_v0  ;;  %1128 = vmatpush3.bf16.msra.mxu1 %v1244_v20 }
  0x3f   : > { %1129 = vmatprep.subr.bf16.mxu1 %v1328_v0 }
  0x41   : > { %v1269_v10 = vpop.eup %1268  ;;  %1110 = vmatpush3.bf16.msra.mxu0 %v1233_v9 }
  0x42   : > { %1200 = vpush %v1269_v10  ;;  %1111 = vmatprep.subr.bf16.mxu0 %v1328_v0  ;;  %1130 = vmatpush3.bf16.msra.mxu1 %v1246_v22 }
  0x43   : > { %1131 = vmatprep.subr.bf16.mxu1 %v1328_v0 }
  0x45   : > { %1112 = vmatpush3.bf16.msra.mxu0 %v1234_v11 }
  0x46   : > { %1113 = vmatprep.subr.bf16.mxu0 %v1328_v0  ;;  %1132 = vmatpush3.bf16.msra.mxu1 %v1248_v24 }
  0x47   : > { %1133 = vmatprep.subr.bf16.mxu1 %v1328_v0 }
  0x49   : > { %1114 = vmatpush3.bf16.msra.mxu0 %v1235_v12  ;;  %v1331_v12 = vmov 1966171168  }
  0x4a   : > { %1139 = vmatprep.subr.bf16.mxu0 %v1328_v0  ;;  %1134 = vmatpush3.bf16.msra.mxu1 %v1250_v26 }
  0x4b   : > { %1159 = vmatprep.subr.bf16.mxu1 %v1328_v0 }
  0x4c   : > { %1116 = vmatmul.mubr.bf16.vlgmr.msra.gmra.mxu0 %v386_v13  ;;  %v682_v13 = vunpack.c.l.s4 %v1331_v12 }
  0x4d   : > { %1140 = vmatpush3.bf16.msra.mxu0 %v1237_v14  ;;  %1155 = vmatprep.mubr.msk.bf16.mxu0 %vm1329_vm0, %v1328_v0  ;;  %v383_v14 = vld [vmem:[%s1512_s4 + $0x1] sm:$0x1] }
  0x4e   : > { %1141 = vmatprep.subr.bf16.mxu0 %v1328_v0  ;;  %v683_v16 = vunpack.c.0.s8 %v682_v13 }
  0x51   : > { %1142 = vmatpush3.bf16.msra.mxu0 %v1239_v15 }
  0x52   : > { %1143 = vmatprep.subr.bf16.mxu0 %v1328_v0 }
  0x55   : > { %1144 = vmatpush3.bf16.msra.mxu0 %v1241_v17  ;;  %v671_v17 = vld [vmem:[%s285_s10] sm:$0x1] }
  0x56   : > { %1145 = vmatprep.subr.bf16.mxu0 %v1328_v0 }
  0x59   : > { %1146 = vmatpush3.bf16.msra.mxu0 %v1243_v19 }
  0x5a   : > { %1147 = vmatprep.subr.bf16.mxu0 %v1328_v0 }
  0x5d   : > { %1148 = vmatpush3.bf16.msra.mxu0 %v1245_v21  ;;  %v686_v21 = vsub.s32 %v683_v16, %v1448_v29 }
  0x5e   : > { %1149 = vmatprep.subr.bf16.mxu0 %v1328_v0 }
  0x61   : > { %1150 = vmatpush3.bf16.msra.mxu0 %v1247_v23 }
  0x62   : > { %1151 = vmatprep.subr.bf16.mxu0 %v1328_v0 }
  0x65   : > { %1152 = vmatpush3.bf16.msra.mxu0 %v1249_v25 }
  0x66   : > { %1153 = vmatprep.subr.bf16.mxu0 %v1328_v0 }
  0x69   : > { %1154 = vmatpush3.bf16.msra.mxu0 %v1251_v27 }
  0x6a   : > { %1179 = vmatprep.subr.bf16.mxu0 %v1328_v0 }
  0x73   : > { %s1201_s25 = spop %1200 }
  0x74   : > { %v492_v45 = vstv %s1201_s25 }
 0x10c   : > { %v473_v32 = vpop.f32.mrf.mxu0 }
 0x10d   : > { %v474_v33 = vadd.f32 %v1011_v31, %v473_v32  ;;  %v1267_v31 = vld [vmem:[#allocation4 + $0x10] ss:$20 sps:$4 sm:$0xff]   ;;  %v385_v32 = vld [vmem:[%s1512_s4 + $0x3] sm:$0x1] }
 0x10e   : > { %v1117_v35 = vpop.f32.mrf.mxu0 }
 0x10f   : > { %v479_v36 = vmax.f32 %v474_v33, 0.0 }
 0x110   : > { %v476_v37 = vpop.f32.mrf.mxu0 }
 0x111   : > { %v482_v38 = vmul.f32 %v1456_v34, %v479_v36 }
 0x112   : > { %v1118_v39 = vpop.f32.mrf.mxu0 }
 0x113   : > { %v483_v40 = vrot.slane %v482_v38, 4 }
 0x115   : > { %v484_v41 = vadd.f32 %v483_v40, %v482_v38  ;;  %v891_v40 = vsub.s32 0, %v1448_v29 }
 0x117   : > { %v485_v42 = vrot.slane %v484_v41, 2 }
 0x119   : > { %v486_v43 = vadd.f32 %v485_v42, %v484_v41 }
 0x11b   : > { %v487_v44 = vrot.slane %v486_v43, 1 }
 0x11d   : > { %v488_v46 = vadd.f32 %v487_v44, %v486_v43 }
 0x11f   : > { %v493_v47 = vmul.f32 %v492_v45, %v488_v46 }
 0x121   : > { %v494_v49 = vpack.c.bf16 %v493_v47, %v493_v47 }
 0x123   : > { %1136 = vmatmul.mubr.bf16.vlgmr.msra.gmra.mxu1 %v494_v49  ;;  %1156 = vmatmul.mubr.bf16.vlgmr.msra.gmra.mxu0 %v494_v49 }
 0x124   : > { %1160 = vmatpush3.bf16.msra.mxu1 %v1252_v48  ;;  %1175 = vmatprep.mubr.msk.bf16.mxu1 %vm1329_vm0, %v1328_v0 }
 0x125   : > { %1161 = vmatprep.subr.bf16.mxu1 %v1328_v0  ;;  %1195 = vmatprep.mubr.msk.bf16.mxu0 %vm1329_vm0, %v1328_v0 }
 0x126   : > { %1180 = vmatpush3.bf16.msra.mxu0 %v1260_v57 }
 0x127   : > { %1181 = vmatprep.subr.bf16.mxu0 %v1328_v0 }
 0x128   : > { %1162 = vmatpush3.bf16.msra.mxu1 %v1253_v50 }
 0x129   : > { %1163 = vmatprep.subr.bf16.mxu1 %v1328_v0 }
 0x12a   : > { %1182 = vmatpush3.bf16.msra.mxu0 %v1261_v58 }
 0x12b   : > { %1183 = vmatprep.subr.bf16.mxu0 %v1328_v0 }
 0x12c   : > { %1164 = vmatpush3.bf16.msra.mxu1 %v1254_v51 }
 0x12d   : > { %1165 = vmatprep.subr.bf16.mxu1 %v1328_v0 }
 0x12e   : > { %1184 = vmatpush3.bf16.msra.mxu0 %v1262_v59 }
 0x12f   : > { %1185 = vmatprep.subr.bf16.mxu0 %v1328_v0 }
 0x130   : > { %1166 = vmatpush3.bf16.msra.mxu1 %v1255_v52 }
 0x131   : > { %1167 = vmatprep.subr.bf16.mxu1 %v1328_v0 }
 0x132   : > { %1186 = vmatpush3.bf16.msra.mxu0 %v1263_v60 }
 0x133   : > { %1187 = vmatprep.subr.bf16.mxu0 %v1328_v0 }
 0x134   : > { %1168 = vmatpush3.bf16.msra.mxu1 %v1256_v53 }
 0x135   : > { %1169 = vmatprep.subr.bf16.mxu1 %v1328_v0 }
 0x136   : > { %1188 = vmatpush3.bf16.msra.mxu0 %v1264_v61 }
 0x137   : > { %1189 = vmatprep.subr.bf16.mxu0 %v1328_v0 }
 0x138   : > { %1170 = vmatpush3.bf16.msra.mxu1 %v1257_v54 }
 0x139   : > { %1171 = vmatprep.subr.bf16.mxu1 %v1328_v0 }
 0x13a   : > { %1190 = vmatpush3.bf16.msra.mxu0 %v1265_v62 }
 0x13b   : > { %1191 = vmatprep.subr.bf16.mxu0 %v1328_v0 }
 0x13c   : > { %1172 = vmatpush3.bf16.msra.mxu1 %v1258_v55 }
 0x13d   : > { %1173 = vmatprep.subr.bf16.mxu1 %v1328_v0 }
 0x13e   : > { %1192 = vmatpush3.bf16.msra.mxu0 %v1266_v30 }
 0x13f   : > { %1193 = vmatprep.subr.bf16.mxu0 %v1328_v0  ;;  %v888_v0 = vld [vmem:[%s1513_s5] sm:$0xff] }
 0x140   : > { %1174 = vmatpush3.bf16.msra.mxu1 %v1259_v56 }
 0x142   : > { %1194 = vmatpush3.bf16.msra.mxu0 %v1267_v31 }
 0x1e3   : > { %v577_v1 = vpop.f32.mrf.mxu1  ;;  %v665_v2 = vpop.f32.mrf.mxu0 }
 0x1e4   : > { %v666_v3 = vadd.f32 %v665_v2, %v384_v63  ;;  %v578_v15 = vadd.f32 %v577_v1, %v383_v14 }
 0x1e5   : > { %v1137_v4 = vpop.f32.mrf.mxu1  ;;  %v1157_v5 = vpop.f32.mrf.mxu0 }
 0x1e6   : > { %v672_v6 = vmul.f32 0.5, %v666_v3  ;;  %v680_v20 = vcombine.low %v578_v15, %v666_v3 }
 0x1e7   : > { %v580_v7 = vpop.f32.mrf.mxu1  ;;  %v668_v8 = vpop.f32.mrf.mxu0 }
 0x1e8   : > { %v673_v9 = vmul.f32 1.442695, %v672_v6  ;;  %v687_v23 = vrot.slane %v680_v20, %v686_v21 }
 0x1e9   : > { %v1138_v10 = vpop.f32.mrf.mxu1  ;;  %v1158_v11 = vpop.f32.mrf.mxu0 }
 0x1ea   : > { %1270 = vpow2.f32 %v673_v9 }
 0x1f7   : > { %v1271_v18 = vpop.eup %1270 }
 0x1f8   : > { %v675_v19 = vmul.f32 %v1271_v18, %v671_v17 }
 0x1fa   : > { %v676_v22 = vadd.f32 %v675_v19, %v578_v15 }
 0x1fc   : > { %v694_v24 = vrot.slane %v676_v22, %v686_v21  ;;  %v709_v25 = vpack.c.bf16 %v676_v22, %v676_v22 }
 0x1fe   : > { %v695_v26 = vcombine.low %v687_v23, %v694_v24  ;;  %1176 = vmatmul.mubr.bf16.vlgmr.msra.gmra.mxu1 %v709_v25 }
 0x200   : > { %v702_v27 = vrot.slane %v695_v26, %v686_v21 }
 0x202   : > { %708 = vst.msk [vmem:[%s289_s14] sm:$0x7] %vm706_vm2, %v702_v27 }
 0x2be   : > { %v792_v33 = vpop.f32.mrf.mxu1 }
 0x2bf   : > { %v793_v35 = vadd.f32 %v792_v33, %v385_v32 }
 0x2c0   : > { %v1177_v36 = vpop.f32.mrf.mxu1 }
 0x2c1   : > { %v798_v37 = vmax.f32 %v793_v35, 0.0 }
 0x2c2   : > { %v795_v38 = vpop.f32.mrf.mxu1 }
 0x2c3   : > { %v799_v39 = vpack.c.bf16 %v798_v37, %v798_v37 }
 0x2c4   : > { %v1178_v28 = vpop.f32.mrf.mxu1 }
 0x2c5   : > { %1196 = vmatmul.mubr.bf16.vlgmr.msra.gmra.mxu0 %v799_v39 }
 0x385   : > { %v882_v41 = vpop.f32.mrf.mxu0 }
 0x386   : > { %v892_v42 = vrot.slane %v882_v41, %v891_v40 }
 0x387   : > { %v1197_v43 = vpop.f32.mrf.mxu0 }
 0x388   : > { %v893_v44 = vadd.f32 %v892_v42, %v888_v0 }
 0x389   : > { %v885_v45 = vpop.f32.mrf.mxu0 }
 0x38a   : > { %v894_v46 = vmul.f32 %v1456_v34, %v893_v44 }
 0x38b   : > { %v1198_v47 = vpop.f32.mrf.mxu0 }
 0x38c   : > { %895 = vst [vmem:[%s293_s22] sm:$0xff] %v894_v46 }
 0x38d PF: > { %s25_s29 = sadd.s32 1, %s1322_s29  }
 0x38e   : > { %p22_p6 = scmp.ge.s32.totalorder %s25_s29, 4  }
 0x390   :  { %24 = sbr.rel (!%p22_p6) target bundleno = 16 (0x10), region = 90 }
 0x395   :  { %929 = vsyncpa [#allocation5], 1 }
 0x396   :  { %931 = vsyncpa [#allocation5 + $0x1], 1 }

</bundles_post_ra>
